<compile_context>
chip_gen: v5e
topology: v5e:2x2
jax: 0.10.0
libtpu: 0.0.40
codegen_flags: <defaults>
</compile_context>

<pallas_src>
import functools

import jax
import jax.numpy as jnp
from jax.experimental import pallas as pl
from jax.experimental.pallas import tpu as pltpu


PACK = 8           # batch rows packed into one 128-lane VMEM row (8 * in_size=16 = 128)
TILE_ROWS = 512    # packed rows per grid step (= 4096 batch rows); sweep 128-1024


def _round_up(v, m):
    return ((v + m - 1) // m) * m


def mlp_kernel(x_ref, w1_ref, b1_ref, w2_ref, b2_ref, w3_ref, b3_ref, o_ref):
    # layer 1: (rows,128)bf16 @ (128,256)bf16 -> f32 acc; bias + ReLU in f32
    h = jnp.dot(x_ref[...], w1_ref[...], preferred_element_type=jnp.float32)
    h = jnp.maximum(h + b1_ref[...], 0.0)
    # layer 2: (rows,256)bf16 @ (256,256)bf16 -> f32 acc; bias + ReLU in f32
    h = jnp.dot(h.astype(jnp.bfloat16), w2_ref[...],
                preferred_element_type=jnp.float32)
    h = jnp.maximum(h + b2_ref[...], 0.0)
    # layer 3: (rows,256)bf16 @ (256,8)bf16 -> (rows,8); bias is an SMEM scalar
    out = jnp.dot(h.astype(jnp.bfloat16), w3_ref[...],
                  preferred_element_type=jnp.float32)
    o_ref[...] = (out + b3_ref[0, 0]).astype(o_ref.dtype)


def _build_call(rows, in_lanes, h_lanes, o_lanes, tile_rows, logical_dims):
    grid = (pl.cdiv(rows, tile_rows),)
    b_logical, in_size, hidden, out_size = logical_dims
    flops = 2 * b_logical * (in_size * hidden + hidden * hidden + hidden * out_size)
    bytes_accessed = (
        2 * b_logical * in_size              # x stream (bf16)
        + 4 * b_logical * out_size           # output (f32)
        + 2 * (in_lanes * h_lanes + h_lanes * h_lanes + h_lanes * o_lanes)  # weights
        + 4 * (2 * h_lanes + 1))             # biases
    return pl.pallas_call(
        mlp_kernel,
        out_shape=jax.ShapeDtypeStruct((rows, o_lanes), jnp.float32),
        grid_spec=pltpu.PrefetchScalarGridSpec(
            num_scalar_prefetch=0,
            grid=grid,
            in_specs=[
                pl.BlockSpec((tile_rows, in_lanes), lambda i: (i, 0)),  # x (batch-tiled)
                pl.BlockSpec((in_lanes, h_lanes), lambda i: (0, 0)),    # W1 (resident)
                pl.BlockSpec((1, h_lanes), lambda i: (0, 0)),           # b1 (resident)
                pl.BlockSpec((h_lanes, h_lanes), lambda i: (0, 0)),     # W2 (resident)
                pl.BlockSpec((1, h_lanes), lambda i: (0, 0)),           # b2 (resident)
                pl.BlockSpec((h_lanes, o_lanes), lambda i: (0, 0)),     # W3 (resident)
                pl.BlockSpec(memory_space=pltpu.MemorySpace.SMEM),      # b3 scalar
            ],
            out_specs=pl.BlockSpec((tile_rows, o_lanes), lambda i: (i, 0)),
        ),
        compiler_params=pltpu.CompilerParams(
            dimension_semantics=("parallel",)),
        cost_estimate=pl.CostEstimate(
            flops=flops, transcendentals=0, bytes_accessed=bytes_accessed),
    )


def _block_diag(w, n):
    """Block-diagonal matrix with n diagonal copies of w."""
    r, c = w.shape
    eye = jnp.eye(n, dtype=w.dtype)
    return jnp.einsum("ab,ij->aibj", eye, w).reshape(n * r, n * c)


@functools.partial(jax.jit, static_argnames=("tile_rows",))
def car_price_model(x, params, *, tile_rows=TILE_ROWS):
    """Fused forward pass. x: [B, input_size] float32, any B."""
    w1, b1, w2, b2, w3, b3 = params
    B, in_size = x.shape
    hidden = w1.shape[1]
    out_size = w3.shape[1]
    assert out_size == 1, "b3 is kept as an SMEM scalar (out_size == 1)"

    # Pad only to a multiple of PACK (tiny; usually a no-op).  Tile-granularity
    # padding is NOT needed: the grid uses cdiv and the partial last block's
    # out-of-bounds rows are masked on writeback.
    pad = (-B) % PACK
    if pad:
        x = jnp.pad(x, ((0, pad), (0, 0)))
    b_padded = B + pad
    rows = b_padded // PACK

    # Clamp/align the tile so tiny batches don't allocate huge blocks and the
    # sublane dim stays bf16-friendly (multiple of 16).
    tile_rows = _round_up(max(16, tile_rows), 16)
    tile_rows = min(tile_rows, _round_up(rows, 16))

    # Lane packing (pure bitcast reshape) + bf16 streaming of the x stream.
    x_packed = x.reshape(rows, PACK * in_size).astype(jnp.bfloat16)

    # Block-diagonal replicated weights (tiny one-time prep; bf16 for the MXU).
    w1_blk = _block_diag(w1, PACK).astype(jnp.bfloat16)   # (PACK*in,  PACK*hid)
    w2_blk = _block_diag(w2, PACK).astype(jnp.bfloat16)   # (PACK*hid, PACK*hid)
    w3_blk = _block_diag(w3, PACK).astype(jnp.bfloat16)   # (PACK*hid, PACK*out)
    b1_t = jnp.tile(b1, (1, PACK)).astype(jnp.float32)    # (1, PACK*hid)
    b2_t = jnp.tile(b2, (1, PACK)).astype(jnp.float32)    # (1, PACK*hid)
    b3_s = b3.reshape(1, 1).astype(jnp.float32)           # SMEM scalar

    call = _build_call(rows, PACK * in_size, PACK * hidden, PACK * out_size,
                       tile_rows, (b_padded, in_size, hidden, out_size))
    out_packed = call(x_packed, w1_blk, b1_t, w2_blk, b2_t, w3_blk, b3_s)
    # Unpack (rows, PACK*out) -> (B, out): pure bitcast reshape + slice.
    return out_packed.reshape(rows * PACK, out_size)[:B]


def init_params(key, input_size, hidden_size, output_size):
    """Deterministic init matching nn.Linear (weights stored transposed [in, out])."""
    ks = jax.random.split(key, 6)

    def lin(kw, kb, fan_in, fan_out):
        bound = 1.0 / jnp.sqrt(fan_in)
        w = jax.random.uniform(kw, (fan_in, fan_out), jnp.float32, -bound, bound)
        b = jax.random.uniform(kb, (1, fan_out), jnp.float32, -bound, bound)
        return w, b

    w1, b1 = lin(ks[0], ks[1], input_size, hidden_size)
    w2, b2 = lin(ks[2], ks[3], hidden_size, hidden_size)
    w3, b3 = lin(ks[4], ks[5], hidden_size, output_size)
    return (w1, b1, w2, b2, w3, b3)


def reference_forward_f32(x, params):
    w1, b1, w2, b2, w3, b3 = params
    h = jnp.maximum(x @ w1 + b1, 0.0)
    h = jnp.maximum(h @ w2 + b2, 0.0)
    return h @ w3 + b3


def reference_forward_bf16(x, params):
    """Same dtype schedule as the kernel: bf16 matmul inputs, f32 accumulate/elementwise."""
    w1, b1, w2, b2, w3, b3 = params
    bf = jnp.bfloat16
    h = jnp.dot(x.astype(bf), w1.astype(bf), preferred_element_type=jnp.float32)
    h = jnp.maximum(h + b1, 0.0)
    h = jnp.dot(h.astype(bf), w2.astype(bf), preferred_element_type=jnp.float32)
    h = jnp.maximum(h + b2, 0.0)
    out = jnp.dot(h.astype(bf), w3.astype(bf), preferred_element_type=jnp.float32)
    return out + b3


if __name__ == "__main__":
    input_size, hidden_size, output_size = 16, 32, 1

    key = jax.random.PRNGKey(0)
    kx, kp = jax.random.split(key)
    params = init_params(kp, input_size, hidden_size, output_size)

    # Primary run: 1200 rows, tile_rows=64 (= 512 batch rows / step) ->
    # grid of 3 steps (2 full + 1 masked partial) exercising the pipeline.
    batch = 1200
    x = jax.random.normal(kx, (batch, input_size), jnp.float32)
    out = jax.block_until_ready(car_price_model(x, params, tile_rows=64))
    ref32 = reference_forward_f32(x, params)
    refbf = reference_forward_bf16(x, params)
    assert out.shape == (batch, output_size)
    assert jnp.allclose(out, refbf, atol=1e-2, rtol=1e-2), float(
        jnp.max(jnp.abs(out - refbf)))
    assert jnp.allclose(out, ref32, atol=3e-2, rtol=3e-2), float(
        jnp.max(jnp.abs(out - ref32)))

    # Ragged batch (not a multiple of 8, smaller than one tile) exercises the
    # pad-to-8 path and the masked partial-block path with the default tile.
    x_small = x[:37]
    out_small = jax.block_until_ready(car_price_model(x_small, params))
    assert out_small.shape == (37, output_size)
    assert jnp.allclose(out_small, refbf[:37], atol=1e-2, rtol=1e-2)
    assert jnp.allclose(out_small, ref32[:37], atol=3e-2, rtol=3e-2)

    print("KERNEL_OK")
</pallas_src>

<mosaic_0001>
module attributes {stable_mosaic.version = 11 : i64} {
  func.func @mlp_kernel(%arg0: i32, %arg1: memref<64x128xbf16, #tpu.memory_space<vmem>>, %arg2: memref<128x256xbf16, #tpu.memory_space<vmem>>, %arg3: memref<1x256xf32, #tpu.memory_space<vmem>>, %arg4: memref<256x256xbf16, #tpu.memory_space<vmem>>, %arg5: memref<1x256xf32, #tpu.memory_space<vmem>>, %arg6: memref<256x8xbf16, #tpu.memory_space<vmem>>, %arg7: memref<1x1xf32, #tpu.memory_space<smem>>, %arg8: memref<64x8xf32, #tpu.memory_space<vmem>>) attributes {dimension_semantics = [#tpu.dimension_semantics<parallel>], iteration_bounds = array<i64: 3>, scalar_prefetch = 0 : i64, scratch_operands = 0 : i64, tpu.core_type = #tpu.core_type<tc>, window_params = [{transform_indices = @transform_0, window_bounds = array<i64: 64, 128>}, {pipeline_mode = #tpu.pipeline_mode<synchronous>, transform_indices = @transform_1, window_bounds = array<i64: 128, 256>}, {pipeline_mode = #tpu.pipeline_mode<synchronous>, transform_indices = @transform_2, window_bounds = array<i64: 1, 256>}, {pipeline_mode = #tpu.pipeline_mode<synchronous>, transform_indices = @transform_3, window_bounds = array<i64: 256, 256>}, {pipeline_mode = #tpu.pipeline_mode<synchronous>, transform_indices = @transform_4, window_bounds = array<i64: 1, 256>}, {pipeline_mode = #tpu.pipeline_mode<synchronous>, transform_indices = @transform_5, window_bounds = array<i64: 256, 8>}, {transform_indices = @transform_6, window_bounds = array<i64: 1, 1>}, {transform_indices = @transform_7, window_bounds = array<i64: 64, 8>}]} {
    %c0 = arith.constant 0 : index
    %c0_0 = arith.constant 0 : index
    %0 = vector.load %arg1[%c0, %c0_0] : memref<64x128xbf16, #tpu.memory_space<vmem>>, vector<64x128xbf16>
    %c0_1 = arith.constant 0 : index
    %c0_2 = arith.constant 0 : index
    %1 = vector.load %arg2[%c0_1, %c0_2] : memref<128x256xbf16, #tpu.memory_space<vmem>>, vector<128x256xbf16>
    %cst = arith.constant dense<0.000000e+00> : vector<64x256xf32>
    %2 = tpu.matmul %0, %1, %cst {dimension_numbers = #tpu.dot_dimension_numbers<[1], [0], [0], [1], [0, 0, 1, 1], [], []>} : vector<64x128xbf16>, vector<128x256xbf16>, vector<64x256xf32> -> vector<64x256xf32>
    %c0_3 = arith.constant 0 : index
    %c0_4 = arith.constant 0 : index
    %3 = vector.load %arg3[%c0_3, %c0_4] : memref<1x256xf32, #tpu.memory_space<vmem>>, vector<1x256xf32>
    %4 = vector.broadcast %3 : vector<1x256xf32> to vector<64x256xf32>
    %5 = arith.addf %2, %4 : vector<64x256xf32>
    %cst_5 = arith.constant 0.000000e+00 : f32
    %6 = vector.broadcast %cst_5 : f32 to vector<64x256xf32>
    %7 = arith.maximumf %5, %6 : vector<64x256xf32>
    %8 = arith.truncf %7 : vector<64x256xf32> to vector<64x256xbf16>
    %c0_6 = arith.constant 0 : index
    %c0_7 = arith.constant 0 : index
    %9 = vector.load %arg4[%c0_6, %c0_7] : memref<256x256xbf16, #tpu.memory_space<vmem>>, vector<256x256xbf16>
    %cst_8 = arith.constant dense<0.000000e+00> : vector<64x256xf32>
    %10 = tpu.matmul %8, %9, %cst_8 {dimension_numbers = #tpu.dot_dimension_numbers<[1], [0], [0], [1], [0, 0, 1, 1], [], []>} : vector<64x256xbf16>, vector<256x256xbf16>, vector<64x256xf32> -> vector<64x256xf32>
    %c0_9 = arith.constant 0 : index
    %c0_10 = arith.constant 0 : index
    %11 = vector.load %arg5[%c0_9, %c0_10] : memref<1x256xf32, #tpu.memory_space<vmem>>, vector<1x256xf32>
    %12 = vector.broadcast %11 : vector<1x256xf32> to vector<64x256xf32>
    %13 = arith.addf %10, %12 : vector<64x256xf32>
    %cst_11 = arith.constant 0.000000e+00 : f32
    %14 = vector.broadcast %cst_11 : f32 to vector<64x256xf32>
    %15 = arith.maximumf %13, %14 : vector<64x256xf32>
    %16 = arith.truncf %15 : vector<64x256xf32> to vector<64x256xbf16>
    %c0_12 = arith.constant 0 : index
    %c0_13 = arith.constant 0 : index
    %17 = vector.load %arg6[%c0_12, %c0_13] : memref<256x8xbf16, #tpu.memory_space<vmem>>, vector<256x8xbf16>
    %cst_14 = arith.constant dense<0.000000e+00> : vector<64x8xf32>
    %18 = tpu.matmul %16, %17, %cst_14 {dimension_numbers = #tpu.dot_dimension_numbers<[1], [0], [0], [1], [0, 0, 1, 1], [], []>} : vector<64x256xbf16>, vector<256x8xbf16>, vector<64x8xf32> -> vector<64x8xf32>
    %c0_15 = arith.constant 0 : index
    %c0_16 = arith.constant 0 : index
    %19 = memref.load %arg7[%c0_15, %c0_16] : memref<1x1xf32, #tpu.memory_space<smem>>
    %20 = vector.broadcast %19 : f32 to vector<64x8xf32>
    %21 = arith.addf %18, %20 : vector<64x8xf32>
    %c0_17 = arith.constant 0 : index
    %c0_18 = arith.constant 0 : index
    %22 = vector.load %arg8[%c0_17, %c0_18] : memref<64x8xf32, #tpu.memory_space<vmem>>, vector<64x8xf32>
    tpu.vector_store %arg8[%c0_17, %c0_18], %21 {strides = array<i32>} : memref<64x8xf32, #tpu.memory_space<vmem>>, vector<64x8xf32>,
    return
  }
  func.func @transform_0(%arg0: i32) -> (i32, i32) {
    %c0_i32 = arith.constant 0 : i32
    %c0_i32_0 = arith.constant 0 : i32
    return %arg0, %c0_i32 : i32, i32
  }
  func.func @transform_1(%arg0: i32) -> (i32, i32) {
    %c0_i32 = arith.constant 0 : i32
    %c0_i32_0 = arith.constant 0 : i32
    %c0_i32_1 = arith.constant 0 : i32
    return %c0_i32, %c0_i32_0 : i32, i32
  }
  func.func @transform_2(%arg0: i32) -> (i32, i32) {
    %c0_i32 = arith.constant 0 : i32
    %c0_i32_0 = arith.constant 0 : i32
    %c0_i32_1 = arith.constant 0 : i32
    return %c0_i32, %c0_i32_0 : i32, i32
  }
  func.func @transform_3(%arg0: i32) -> (i32, i32) {
    %c0_i32 = arith.constant 0 : i32
    %c0_i32_0 = arith.constant 0 : i32
    %c0_i32_1 = arith.constant 0 : i32
    return %c0_i32, %c0_i32_0 : i32, i32
  }
  func.func @transform_4(%arg0: i32) -> (i32, i32) {
    %c0_i32 = arith.constant 0 : i32
    %c0_i32_0 = arith.constant 0 : i32
    %c0_i32_1 = arith.constant 0 : i32
    return %c0_i32, %c0_i32_0 : i32, i32
  }
  func.func @transform_5(%arg0: i32) -> (i32, i32) {
    %c0_i32 = arith.constant 0 : i32
    %c0_i32_0 = arith.constant 0 : i32
    %c0_i32_1 = arith.constant 0 : i32
    return %c0_i32, %c0_i32_0 : i32, i32
  }
  func.func @transform_6(%arg0: i32) -> (i32, i32) {
    %c0_i32 = arith.constant 0 : i32
    %c0_i32_0 = arith.constant 0 : i32
    %c0_i32_1 = arith.constant 0 : i32
    return %c0_i32, %c0_i32_0 : i32, i32
  }
  func.func @transform_7(%arg0: i32) -> (i32, i32) {
    %c0_i32 = arith.constant 0 : i32
    %c0_i32_0 = arith.constant 0 : i32
    return %arg0, %c0_i32 : i32, i32
  }
}

</mosaic_0001>

<bundles_post_ra>
// kernel: car_price_model.1
= control target key start
LH: loop header
LB: loop body
LE: loop exit
PB: predicated region body
PF: predicated region fallthrough
CT: control target
= control target key end

     0   :  { %s2387_s0 = inlined_call_operand.vmem [shape: bf16[150,128], index: 0, kind: input, shape index: {}]   ;;  %s2388_s1 = inlined_call_operand.vmem [shape: bf16[128,256], index: 1, kind: input, shape index: {}]   ;;  %s2389_s2 = inlined_call_operand.vmem [shape: f32[1,256], index: 2, kind: input, shape index: {}]   ;;  %s2390_s3 = inlined_call_operand.vmem [shape: bf16[256,256], index: 3, kind: input, shape index: {}]   ;;  %s2391_s4 = inlined_call_operand.vmem [shape: f32[1,256], index: 4, kind: input, shape index: {}]   ;;  %s2392_s5 = inlined_call_operand.vmem [shape: bf16[256,8], index: 5, kind: input, shape index: {}]   ;;  %s2393_s6 = inlined_call_operand.<no memory space> [shape: f32[1,1], index: 6, kind: input, shape index: {}]   ;;  %s2394_s7 = inlined_call_operand.vmem [shape: f32[150,8], index: 7, kind: output, shape index: {}]  }
   0x1   :  { %12 = sst [smem:[#allocation2]] %s2393_s6 }
   0x2   :  { %s1882_s26 = smov 0   ;;  %s1884_s27 = smov 0  }
   0x3   :  { %s1886_s28 = smov 0  }
   0x4 LB: > { %s1895_s6 = sadd.s32 4294967295, %s1805_s28   ;;  %s1897_s29 = sadd.s32 1, %s1805_s28   ;;  %s1805_s28 = sphi %s1886_s28, %s2402_s28   ;;  %s1801_s27 = sphi %s1884_s27, %s2401_s27   ;;  %s1797_s26 = sphi %s1882_s26, %s2400_s26  }
   0x5   : > { %s174_s30 = ssub.s32 %s1805_s28, %s1897_s29  ;;  %s177_s8 = sadd.s32 1, %s1801_s27 }
   0x6   : > { %p175_p0 = scmp.eq.s32.totalorder %s174_s30, 0  ;;  %p187_p1 = scmp.ne.s32.totalorder %s1801_s27, %s1797_s26 }
   0x7   : > { %p188_p2 = scmp.eq.s32.totalorder %s1895_s6, 2  ;;  %p1299_p3 = scmp.ge.s32.totalorder %s1805_s28, 1 }
   0x8   : > { %s1905_s9 = scalar_select %p175_p0, %s1801_s27, %s177_s8  }
   0x9   : > { %p1907_p4 = por %p188_p2, %p187_p1  ;;  %p247_p5 = scmp.lt.s32.totalorder %s1805_s28, 4 }
   0xb   : > { %p248_p6 = pnand %p1299_p3, %p247_p5 }
   0xc   : > { %s1972_s15 = sshll.u32 (!%p248_p6), %s1895_s6, 3  ;;  %s887_s28 = sld [smem:[#allocation2]] (!%p248_p6) }
   0xd   : > { %251 = sbr.rel (%p248_p6) target bundleno = 575 (0x23f), region = 48  ;;  %p287_p7 = scmp.lt.s32.totalorder (!%p248_p6), %s1972_s15, 18 }
  0x12   : > { %v1377_v0 = vld [vmem:[%s2388_s1 + $0x70] sm:$0xf]  ;;  %v1611_v1 = vld [vmem:[%s2388_s1 + $0x74] sm:$0xf0]  ;;  %v1610_v2 = vld [vmem:[%s2388_s1 + $0x74] sm:$0xf] }
  0x13   : > { %v1378_v3 = vor.u32 %v1611_v1, %v1377_v0  ;;  %v1379_v4 = vld [vmem:[%s2388_s1 + $0x78] sm:$0xf0]  ;;  %v1369_v5 = vld [vmem:[%s2388_s1 + $0x60] sm:$0xf]  ;;  %v1609_v6 = vld [vmem:[%s2388_s1 + $0x64] sm:$0xf0] }
  0x14   : > { %v1382_v7 = vor.u32 %v1610_v2, %v1379_v4  ;;  %v1608_v8 = vld [vmem:[%s2388_s1 + $0x64] sm:$0xf]  ;;  %v1371_v9 = vld [vmem:[%s2388_s1 + $0x68] sm:$0xf0]  ;;  %v1370_v10 = vor.u32 %v1609_v6, %v1369_v5  ;;  %v1361_v12 = vld [vmem:[%s2388_s1 + $0x50] sm:$0xf] }
  0x15   : > { %435 = vmatpush.bf16.msra.mxu0 %v1378_v3  ;;  %v1374_v11 = vor.u32 %v1608_v8, %v1371_v9  ;;  %v1607_v13 = vld [vmem:[%s2388_s1 + $0x54] sm:$0xf0]  ;;  %v1606_v14 = vld [vmem:[%s2388_s1 + $0x54] sm:$0xf]  ;;  %v1363_v15 = vld [vmem:[%s2388_s1 + $0x58] sm:$0xf0] }
  0x16   : > { %464 = vmatpush.bf16.msra.mxu1 %v1382_v7  ;;  %v1362_v16 = vor.u32 %v1607_v13, %v1361_v12  ;;  %v1366_v17 = vor.u32 %v1606_v14, %v1363_v15  ;;  %v1353_v18 = vld [vmem:[%s2388_s1 + $0x40] sm:$0xf]  ;;  %v1605_v19 = vld [vmem:[%s2388_s1 + $0x44] sm:$0xf0]  ;;  %v1604_v20 = vld [vmem:[%s2388_s1 + $0x44] sm:$0xf] }
  0x17   : > { %v1355_v21 = vld [vmem:[%s2388_s1 + $0x48] sm:$0xf0]  ;;  %v1354_v22 = vor.u32 %v1605_v19, %v1353_v18  ;;  %v1345_v24 = vld [vmem:[%s2388_s1 + $0x30] sm:$0xf]  ;;  %v1603_v25 = vld [vmem:[%s2388_s1 + $0x34] sm:$0xf0] }
  0x18   : > { %v1358_v23 = vor.u32 %v1604_v20, %v1355_v21  ;;  %v1602_v26 = vld [vmem:[%s2388_s1 + $0x34] sm:$0xf]  ;;  %v1347_v27 = vld [vmem:[%s2388_s1 + $0x38] sm:$0xf0]  ;;  %v1346_v28 = vor.u32 %v1603_v25, %v1345_v24  ;;  %v1337_v30 = vld [vmem:[%s2388_s1 + $0x20] sm:$0xf] }
  0x19   : > { %436 = vmatpush.bf16.msra.mxu0 %v1370_v10  ;;  %v1350_v29 = vor.u32 %v1602_v26, %v1347_v27  ;;  %v1601_v31 = vld [vmem:[%s2388_s1 + $0x24] sm:$0xf0]  ;;  %v1600_v32 = vld [vmem:[%s2388_s1 + $0x24] sm:$0xf]  ;;  %v1339_v33 = vld [vmem:[%s2388_s1 + $0x28] sm:$0xf0] }
  0x1a   : > { %465 = vmatpush.bf16.msra.mxu1 %v1374_v11  ;;  %v1338_v34 = vor.u32 %v1601_v31, %v1337_v30  ;;  %v1342_v35 = vor.u32 %v1600_v32, %v1339_v33  ;;  %v1329_v36 = vld [vmem:[%s2388_s1 + $0x10] sm:$0xf]  ;;  %v1599_v37 = vld [vmem:[%s2388_s1 + $0x14] sm:$0xf0]  ;;  %s288_s8 = scalar_select %p287_p7, %s1972_s15, 18  ;;  %vm1043_vm0 = vcmask 64512  }
  0x1b   : > { %v1598_v38 = vld [vmem:[%s2388_s1 + $0x14] sm:$0xf]  ;;  %v1331_v39 = vld [vmem:[%s2388_s1 + $0x18] sm:$0xf0]  ;;  %v1330_v40 = vor.u32 %v1599_v37, %v1329_v36  ;;  %v1321_v42 = vld [vmem:[%s2388_s1] sm:$0xf] }
  0x1c   : > { %v1334_v41 = vor.u32 %v1598_v38, %v1331_v39  ;;  %v1597_v43 = vld [vmem:[%s2388_s1 + $0x4] sm:$0xf0]  ;;  %s1302_s20 = sshll.u32 %s288_s8, 2  ;;  %v1596_v44 = vld [vmem:[%s2388_s1 + $0x4] sm:$0xf]  ;;  %s279_s8 = sand.u32 1, %s1797_s26  }
  0x1d   : > { %437 = vmatpush.bf16.msra.mxu0 %v1362_v16  ;;  %v1323_v45 = vld [vmem:[%s2388_s1 + $0x8] sm:$0xf0]  ;;  %v1322_v46 = vor.u32 %v1597_v43, %v1321_v42  ;;  %s2015_s30 = scalar_lea.vmem %s2387_s0, %s1302_s20  ;;  %v1626_v50 = vld [vmem:[%s2390_s3 + $0x74] sm:$0xf]  ;;  %v1443_v51 = vld [vmem:[%s2390_s3 + $0x78] sm:$0xf0] }
  0x1e   : > { %466 = vmatpush.bf16.msra.mxu1 %v1366_v17  ;;  %v1326_v47 = vor.u32 %v1596_v44, %v1323_v45  ;;  %v1592_v48 = vld [vmem:[%s2015_s30] sm:$0xff]  ;;  %v1593_v49 = vld [vmem:[%s2015_s30 + $0x8] sm:$0xff]  ;;  %v1642_v52 = vld [vmem:[%s2390_s3 + $0xf4] sm:$0xf]  ;;  %v1446_v53 = vor.u32 %v1626_v50, %v1443_v51  ;;  %s1300_s11 = sshll.u32 %s279_s8, 6  ;;  %s1060_s26 = ssub.s32 (%p1907_p4), 19, %s1972_s15 }
  0x1f   : > { %v1507_v54 = vld [vmem:[%s2390_s3 + $0xf8] sm:$0xf0]  ;;  %v1624_v55 = vld [vmem:[%s2390_s3 + $0x64] sm:$0xf]  ;;  %v1435_v56 = vld [vmem:[%s2390_s3 + $0x68] sm:$0xf0] }
  0x20   : > { %v1510_v57 = vor.u32 %v1642_v52, %v1507_v54  ;;  %v1640_v58 = vld [vmem:[%s2390_s3 + $0xe4] sm:$0xf]  ;;  %v1499_v59 = vld [vmem:[%s2390_s3 + $0xe8] sm:$0xf0]  ;;  %v1438_v60 = vor.u32 %v1624_v55, %v1435_v56  ;;  %v1622_v61 = vld [vmem:[%s2390_s3 + $0x54] sm:$0xf] }
  0x21   : > { %438 = vmatpush.bf16.msra.mxu0 %v1354_v22  ;;  %v1427_v62 = vld [vmem:[%s2390_s3 + $0x58] sm:$0xf0]  ;;  %v1502_v63 = vor.u32 %v1640_v58, %v1499_v59  ;;  %v1638_v0 = vld [vmem:[%s2390_s3 + $0xd4] sm:$0xf]  ;;  %v1441_v2 = vld [vmem:[%s2390_s3 + $0x70] sm:$0xf] }
  0x22   : > { %467 = vmatpush.bf16.msra.mxu1 %v1358_v23  ;;  %v1491_v1 = vld [vmem:[%s2390_s3 + $0xd8] sm:$0xf0]  ;;  %v1627_v3 = vld [vmem:[%s2390_s3 + $0x74] sm:$0xf0]  ;;  %v1505_v4 = vld [vmem:[%s2390_s3 + $0xf0] sm:$0xf]  ;;  %v1430_v9 = vor.u32 %v1622_v61, %v1427_v62 }
  0x23   : > { %v1643_v5 = vld [vmem:[%s2390_s3 + $0xf4] sm:$0xf0]  ;;  %v1442_v6 = vor.u32 %v1627_v3, %v1441_v2  ;;  %v1433_v8 = vld [vmem:[%s2390_s3 + $0x60] sm:$0xf]  ;;  %v1625_v10 = vld [vmem:[%s2390_s3 + $0x64] sm:$0xf0]  ;;  %v1494_v13 = vor.u32 %v1638_v0, %v1491_v1 }
  0x24   : > { %v1506_v7 = vor.u32 %v1643_v5, %v1505_v4  ;;  %v1497_v11 = vld [vmem:[%s2390_s3 + $0xe0] sm:$0xf]  ;;  %v1641_v12 = vld [vmem:[%s2390_s3 + $0xe4] sm:$0xf0]  ;;  %v1434_v14 = vor.u32 %v1625_v10, %v1433_v8  ;;  %v1620_v15 = vld [vmem:[%s2390_s3 + $0x44] sm:$0xf] }
  0x25   : > { %439 = vmatpush.bf16.msra.mxu0 %v1346_v28  ;;  %715 = vmatpush.bf16.msra.mxu2 %v1442_v6  ;;  %v1419_v16 = vld [vmem:[%s2390_s3 + $0x48] sm:$0xf0]  ;;  %v1636_v17 = vld [vmem:[%s2390_s3 + $0xc4] sm:$0xf]  ;;  %v1498_v18 = vor.u32 %v1641_v12, %v1497_v11  ;;  %v1425_v20 = vld [vmem:[%s2390_s3 + $0x50] sm:$0xf] }
  0x26   : > { %468 = vmatpush.bf16.msra.mxu1 %v1350_v29  ;;  %744 = vmatpush.bf16.msra.mxu3 %v1506_v7  ;;  %v1483_v19 = vld [vmem:[%s2390_s3 + $0xc8] sm:$0xf0]  ;;  %v1623_v21 = vld [vmem:[%s2390_s3 + $0x54] sm:$0xf0]  ;;  %v1594_v22 = vld [vmem:[%s2015_s30 + $0x10] sm:$0xff]  ;;  %v1422_v25 = vor.u32 %v1620_v15, %v1419_v16  ;;  %s2308_s12 = scalar_lea.vmem [#allocation3], %s1300_s11  }
  0x27   : > { %v1489_v23 = vld [vmem:[%s2390_s3 + $0xd0] sm:$0xf]  ;;  %v1639_v24 = vld [vmem:[%s2390_s3 + $0xd4] sm:$0xf0]  ;;  %v1486_v26 = vor.u32 %v1636_v17, %v1483_v19  ;;  %v1618_v27 = vld [vmem:[%s2390_s3 + $0x34] sm:$0xf]  ;;  %v1426_v29 = vor.u32 %v1623_v21, %v1425_v20 }
  0x28   : > { %v1411_v28 = vld [vmem:[%s2390_s3 + $0x38] sm:$0xf0]  ;;  %v1634_v30 = vld [vmem:[%s2390_s3 + $0xb4] sm:$0xf]  ;;  %v1490_v31 = vor.u32 %v1639_v24, %v1489_v23  ;;  %v1417_v33 = vld [vmem:[%s2390_s3 + $0x40] sm:$0xf] }
  0x29   : > { %440 = vmatpush.bf16.msra.mxu0 %v1338_v34  ;;  %716 = vmatpush.bf16.msra.mxu2 %v1434_v14  ;;  %v1475_v32 = vld [vmem:[%s2390_s3 + $0xb8] sm:$0xf0]  ;;  %v1621_v34 = vld [vmem:[%s2390_s3 + $0x44] sm:$0xf0]  ;;  %v1414_v37 = vor.u32 %v1618_v27, %v1411_v28  ;;  %v1409_v45 = vld [vmem:[%s2390_s3 + $0x30] sm:$0xf] }
  0x2a   : > { %469 = vmatpush.bf16.msra.mxu1 %v1342_v35  ;;  %745 = vmatpush.bf16.msra.mxu3 %v1498_v18  ;;  %v1481_v35 = vld [vmem:[%s2390_s3 + $0xc0] sm:$0xf]  ;;  %v1637_v36 = vld [vmem:[%s2390_s3 + $0xc4] sm:$0xf0]  ;;  %v1478_v38 = vor.u32 %v1634_v30, %v1475_v32  ;;  %v1418_v39 = vor.u32 %v1621_v34, %v1417_v33  ;;  %v1595_v44 = vld [vmem:[%s2015_s30 + $0x18] sm:$0xff]  ;;  %s1660_s13 = sshll.u32 (%p1907_p4), %s1895_s6, 6 }
  0x2b   : > { %v1482_v42 = vor.u32 %v1637_v36, %v1481_v35  ;;  %v1632_v51 = vld [vmem:[%s2390_s3 + $0xa4] sm:$0xf]  ;;  %v1467_v52 = vld [vmem:[%s2390_s3 + $0xa8] sm:$0xf0]  ;;  %v1401_v54 = vld [vmem:[%s2390_s3 + $0x20] sm:$0xf]  ;;  %s2333_s16 = scalar_lea.vmem (%p1907_p4), %s2394_s7, %s1660_s13  }
  0x2c   : > { %v1617_v55 = vld [vmem:[%s2390_s3 + $0x24] sm:$0xf0]  ;;  %v1465_v56 = vld [vmem:[%s2390_s3 + $0xa0] sm:$0xf]  ;;  %v1614_v59 = vld [vmem:[%s2390_s3 + $0x14] sm:$0xf] }
  0x2d   : > { %441 = vmatpush.bf16.msra.mxu0 %v1330_v40  ;;  %717 = vmatpush.bf16.msra.mxu2 %v1426_v29  ;;  %v1616_v40 = vld [vmem:[%s2390_s3 + $0x24] sm:$0xf]  ;;  %v1633_v58 = vld [vmem:[%s2390_s3 + $0xa4] sm:$0xf0]  ;;  %v1615_v0 = vld [vmem:[%s2390_s3 + $0x14] sm:$0xf0] }
  0x2e   : > { %470 = vmatpush.bf16.msra.mxu1 %v1334_v41  ;;  %v1403_v41 = vld [vmem:[%s2390_s3 + $0x28] sm:$0xf0]  ;;  %746 = vmatpush.bf16.msra.mxu3 %v1490_v31  ;;  %v1466_v61 = vor.u32 %v1633_v58, %v1465_v56  ;;  %v1457_v1 = vld [vmem:[%s2390_s3 + $0x90] sm:$0xf]  ;;  %v1631_v3 = vld [vmem:[%s2390_s3 + $0x94] sm:$0xf0] }
  0x2f   : > { %v1406_v43 = vor.u32 %v1616_v40, %v1403_v41  ;;  %v1630_v4 = vld [vmem:[%s2390_s3 + $0x94] sm:$0xf]  ;;  %v1459_v5 = vld [vmem:[%s2390_s3 + $0x98] sm:$0xf0]  ;;  %v1458_v6 = vor.u32 %v1631_v3, %v1457_v1  ;;  %v1385_v8 = vld [vmem:[%s2390_s3] sm:$0xf] }
  0x30   : > { %v1462_v7 = vor.u32 %v1630_v4, %v1459_v5  ;;  %v1449_v10 = vld [vmem:[%s2390_s3 + $0x80] sm:$0xf]  ;;  %v1629_v12 = vld [vmem:[%s2390_s3 + $0x84] sm:$0xf0]  ;;  %v1387_v14 = vld [vmem:[%s2390_s3 + $0x8] sm:$0xf0] }
  0x31   : > { %442 = vmatpush.bf16.msra.mxu0 %v1322_v46  ;;  %718 = vmatpush.bf16.msra.mxu2 %v1418_v39  ;;  %v1619_v46 = vld [vmem:[%s2390_s3 + $0x34] sm:$0xf0]  ;;  %v1450_v15 = vor.u32 %v1629_v12, %v1449_v10  ;;  %v1628_v17 = vld [vmem:[%s2390_s3 + $0x84] sm:$0xf]  ;;  %v1451_v18 = vld [vmem:[%s2390_s3 + $0x88] sm:$0xf0] }
  0x32   : > { %471 = vmatpush.bf16.msra.mxu1 %v1326_v47  ;;  %747 = vmatpush.bf16.msra.mxu3 %v1482_v42  ;;  %v1473_v47 = vld [vmem:[%s2390_s3 + $0xb0] sm:$0xf]  ;;  %v1454_v19 = vor.u32 %v1628_v17, %v1451_v18  ;;  %v325_v20 = vld [vmem:[%s2389_s2] sm:$0x3]  ;;  %v1657_v58 = vld [vmem:[%s2392_s5 + $0x68] sm:$0xff]  ;;  %p1061_p8 = scmp.lt.s32.totalorder (%p1907_p4), %s1060_s26, 8 }
  0x33   : > { %v2216_v23 = vperm.slane %v325_v20, 0  ;;  %v2218_v24 = vperm.slane %v325_v20, 1  ;;  %v1658_v56 = vld [vmem:[%s2392_s5 + $0x70] sm:$0xff]  ;;  %v1648_v1 = vld [vmem:[%s2392_s5 + $0x20] sm:$0xff]  ;;  %v1655_v10 = vld [vmem:[%s2392_s5 + $0x58] sm:$0xff] }
  0x34   : > { %443 = vmatmul.bf16.vlgmr.msra.gmra.mxu0 %v1592_v48 }
  0x35   : > { %472 = vmatmul.bf16.vlgmr.msra.gmra.mxu1 %v1592_v48  ;;  %773 = vmatpush.bf16.msrb.mxu0 %v1446_v53  ;;  %v1410_v48 = vor.u32 %v1619_v46, %v1409_v45  ;;  %v1470_v53 = vor.u32 %v1632_v51, %v1467_v52  ;;  %v1651_v52 = vld [vmem:[%s2392_s5 + $0x38] sm:$0xff] }
  0x36   : > { %802 = vmatpush.bf16.msrb.mxu1 %v1510_v57  ;;  %v1402_v57 = vor.u32 %v1617_v55, %v1401_v54  ;;  %v1650_v55 = vld [vmem:[%s2392_s5 + $0x30] sm:$0xff] }
  0x37   : > { %719 = vmatpush.bf16.msra.mxu2 %v1410_v48 }
  0x39   : > { %774 = vmatpush.bf16.msrb.mxu0 %v1438_v60  ;;  %v1395_v60 = vld [vmem:[%s2390_s3 + $0x18] sm:$0xf0] }
  0x3a   : > { %803 = vmatpush.bf16.msrb.mxu1 %v1502_v63  ;;  %v1398_v62 = vor.u32 %v1614_v59, %v1395_v60  ;;  %v1393_v63 = vld [vmem:[%s2390_s3 + $0x10] sm:$0xf] }
  0x3b   : > { %720 = vmatpush.bf16.msra.mxu2 %v1402_v57  ;;  %v1394_v2 = vor.u32 %v1615_v0, %v1393_v63  ;;  %v1649_v57 = vld [vmem:[%s2392_s5 + $0x28] sm:$0xff] }
  0x3d   : > { %775 = vmatpush.bf16.msrb.mxu0 %v1430_v9  ;;  %v1613_v9 = vld [vmem:[%s2390_s3 + $0x4] sm:$0xf0] }
  0x3e   : > { %804 = vmatpush.bf16.msrb.mxu1 %v1494_v13  ;;  %v1386_v11 = vor.u32 %v1613_v9, %v1385_v8  ;;  %v1612_v13 = vld [vmem:[%s2390_s3 + $0x4] sm:$0xf]  ;;  %v1647_v9 = vld [vmem:[%s2392_s5 + $0x18] sm:$0xff] }
  0x3f   : > { %721 = vmatpush.bf16.msra.mxu2 %v1394_v2  ;;  %v1390_v16 = vor.u32 %v1612_v13, %v1387_v14  ;;  %v1656_v2 = vld [vmem:[%s2392_s5 + $0x60] sm:$0xff]  ;;  %v1646_v13 = vld [vmem:[%s2392_s5 + $0x10] sm:$0xff] }
  0x41   : > { %776 = vmatpush.bf16.msrb.mxu0 %v1422_v25 }
  0x42   : > { %805 = vmatpush.bf16.msrb.mxu1 %v1486_v26 }
  0x43   : > { %722 = vmatpush.bf16.msra.mxu2 %v1386_v11 }
  0x44   : > { %448 = vmatmul.bf16.gmra.mxu0 %v1593_v49 }
  0x45   : > { %477 = vmatmul.bf16.gmra.mxu1 %v1593_v49  ;;  %777 = vmatpush.bf16.msrb.mxu0 %v1414_v37  ;;  %v1635_v49 = vld [vmem:[%s2390_s3 + $0xb4] sm:$0xf0] }
  0x46   : > { %806 = vmatpush.bf16.msrb.mxu1 %v1478_v38  ;;  %v1474_v50 = vor.u32 %v1635_v49, %v1473_v47 }
  0x47   : > { %985 = vmatpush.bf16.msrb.mxu2 %v1651_v52 }
  0x48   : > { %748 = vmatpush.bf16.msra.mxu3 %v1474_v50 }
  0x49   : > { %778 = vmatpush.bf16.msrb.mxu0 %v1406_v43 }
  0x4a   : > { %807 = vmatpush.bf16.msrb.mxu1 %v1470_v53  ;;  %v1659_v53 = vld [vmem:[%s2392_s5 + $0x78] sm:$0xff] }
  0x4b   : > { %986 = vmatpush.bf16.msrb.mxu2 %v1650_v55 }
  0x4c   : > { %749 = vmatpush.bf16.msra.mxu3 %v1466_v61 }
  0x4d   : > { %779 = vmatpush.bf16.msrb.mxu0 %v1398_v62 }
  0x4e   : > { %808 = vmatpush.bf16.msrb.mxu1 %v1462_v7 }
  0x4f   : > { %987 = vmatpush.bf16.msrb.mxu2 %v1649_v57 }
  0x50   : > { %750 = vmatpush.bf16.msra.mxu3 %v1458_v6 }
  0x51   : > { %780 = vmatpush.bf16.msrb.mxu0 %v1390_v16 }
  0x52   : > { %809 = vmatpush.bf16.msrb.mxu1 %v1454_v19 }
  0x53   : > { %988 = vmatpush.bf16.msrb.mxu2 %v1648_v1 }
  0x54   : > { %453 = vmatmul.bf16.gmra.mxu0 %v1594_v22  ;;  %751 = vmatpush.bf16.msra.mxu3 %v1450_v15 }
  0x55   : > { %482 = vmatmul.bf16.gmra.mxu1 %v1594_v22 }
  0x57   : > { %989 = vmatpush.bf16.msrb.mxu2 %v1647_v9 }
  0x58   : > { %1014 = vmatpush.bf16.msrb.mxu3 %v1659_v53 }
  0x5b   : > { %990 = vmatpush.bf16.msrb.mxu2 %v1646_v13 }
  0x5c   : > { %1015 = vmatpush.bf16.msrb.mxu3 %v1658_v56 }
  0x60   : > { %1016 = vmatpush.bf16.msrb.mxu3 %v1657_v58 }
  0x64   : > { %458 = vmatmul.bf16.gmra.mxu0 %v1595_v44  ;;  %1017 = vmatpush.bf16.msrb.mxu3 %v1656_v2 }
  0x65   : > { %487 = vmatmul.bf16.gmra.mxu1 %v1595_v44 }
  0x68   : > { %1018 = vmatpush.bf16.msrb.mxu3 %v1655_v10 }
  0xb1   : > { %v444_v21 = vpop.f32.mrf.mxu0 }
  0xb2   : > { %v473_v22 = vpop.f32.mrf.mxu1  ;;  %v445_v25 = vadd.f32 %v444_v21, %v2216_v23 }
  0xb3   : > { %v474_v26 = vadd.f32 %v473_v22, %v2218_v24 }
  0xb4   : > { %v493_v31 = vmax.f32 %v445_v25, 0.0 }
  0xb5   : > { %v494_v33 = vmax.f32 %v474_v26, 0.0 }
  0xb9   : > { %v446_v27 = vpop.f32.mrf.mxu0 }
  0xba   : > { %v447_v28 = vadd.f32 %v446_v27, %v2216_v23  ;;  %v475_v29 = vpop.f32.mrf.mxu1 }
  0xbb   : > { %v476_v30 = vadd.f32 %v475_v29, %v2218_v24  ;;  %v1652_v29 = vld [vmem:[%s2392_s5 + $0x40] sm:$0xff] }
  0xbc   : > { %v495_v32 = vmax.f32 %v447_v28, 0.0  ;;  %v1654_v28 = vld [vmem:[%s2392_s5 + $0x50] sm:$0xff] }
  0xbd   : > { %v496_v34 = vmax.f32 %v476_v30, 0.0  ;;  %1019 = vmatpush.bf16.msrb.mxu3 %v1654_v28  ;;  %v1644_v30 = vld [vmem:[%s2392_s5] sm:$0xff] }
  0xbe   : > { %v509_v35 = vpack.c.bf16 %v495_v32, %v493_v31  ;;  %v549_v31 = vld [vmem:[%s2391_s4] sm:$0x3] }
  0xbf   : > { %v510_v36 = vpack.c.bf16 %v496_v34, %v494_v33  ;;  %v2287_v33 = vperm.slane %v549_v31, 1 }
  0xc0   : > { %723 = vmatmul.bf16.vlgmr.msra.gmra.mxu2 %v509_v35  ;;  %781 = vmatmul.bf16.vlgmr.msrb.gmra.mxu0 %v509_v35 }
  0xc1   : > { %752 = vmatmul.bf16.vlgmr.msra.gmra.mxu3 %v510_v36  ;;  %810 = vmatmul.bf16.vlgmr.msrb.gmra.mxu1 %v510_v36  ;;  %v449_v37 = vpop.f32.mrf.mxu0 }
  0xc2   : > { %v478_v38 = vpop.f32.mrf.mxu1  ;;  %v450_v39 = vadd.f32 %v449_v37, %v2216_v23  ;;  %v2290_v37 = vperm.slane %v549_v31, 0 }
  0xc3   : > { %v479_v40 = vadd.f32 %v478_v38, %v2218_v24 }
  0xc4   : > { %v497_v45 = vmax.f32 %v450_v39, 0.0 }
  0xc5   : > { %v498_v47 = vmax.f32 %v479_v40, 0.0 }
  0xc9   : > { %v451_v41 = vpop.f32.mrf.mxu0 }
  0xca   : > { %v452_v42 = vadd.f32 %v451_v41, %v2216_v23  ;;  %v480_v43 = vpop.f32.mrf.mxu1 }
  0xcb   : > { %v481_v44 = vadd.f32 %v480_v43, %v2218_v24 }
  0xcc   : > { %v499_v46 = vmax.f32 %v452_v42, 0.0 }
  0xcd   : > { %v500_v48 = vmax.f32 %v481_v44, 0.0 }
  0xce   : > { %v511_v49 = vpack.c.bf16 %v499_v46, %v497_v45 }
  0xcf   : > { %v512_v50 = vpack.c.bf16 %v500_v48, %v498_v47 }
  0xd0   : > { %728 = vmatmul.bf16.gmra.mxu2 %v511_v49  ;;  %786 = vmatmul.bf16.gmra.mxu0 %v511_v49 }
  0xd1   : > { %757 = vmatmul.bf16.gmra.mxu3 %v512_v50  ;;  %815 = vmatmul.bf16.gmra.mxu1 %v512_v50  ;;  %v454_v51 = vpop.f32.mrf.mxu0 }
  0xd2   : > { %v483_v54 = vpop.f32.mrf.mxu1  ;;  %v455_v59 = vadd.f32 %v454_v51, %v2216_v23 }
  0xd3   : > { %v484_v60 = vadd.f32 %v483_v54, %v2218_v24 }
  0xd4   : > { %v501_v3 = vmax.f32 %v455_v59, 0.0 }
  0xd5   : > { %v502_v5 = vmax.f32 %v484_v60, 0.0 }
  0xd9   : > { %v456_v61 = vpop.f32.mrf.mxu0 }
  0xda   : > { %v457_v62 = vadd.f32 %v456_v61, %v2216_v23  ;;  %v485_v63 = vpop.f32.mrf.mxu1 }
  0xdb   : > { %v486_v0 = vadd.f32 %v485_v63, %v2218_v24 }
  0xdc   : > { %v503_v4 = vmax.f32 %v457_v62, 0.0 }
  0xdd   : > { %v504_v6 = vmax.f32 %v486_v0, 0.0 }
  0xde   : > { %v513_v7 = vpack.c.bf16 %v503_v4, %v501_v3 }
  0xdf   : > { %v514_v8 = vpack.c.bf16 %v504_v6, %v502_v5 }
  0xe0   : > { %733 = vmatmul.bf16.gmra.mxu2 %v513_v7  ;;  %791 = vmatmul.bf16.gmra.mxu0 %v513_v7 }
  0xe1   : > { %762 = vmatmul.bf16.gmra.mxu3 %v514_v8  ;;  %820 = vmatmul.bf16.gmra.mxu1 %v514_v8  ;;  %v459_v11 = vpop.f32.mrf.mxu0 }
  0xe2   : > { %v488_v12 = vpop.f32.mrf.mxu1  ;;  %v460_v14 = vadd.f32 %v459_v11, %v2216_v23 }
  0xe3   : > { %v489_v15 = vadd.f32 %v488_v12, %v2218_v24 }
  0xe4   : > { %v505_v20 = vmax.f32 %v460_v14, 0.0 }
  0xe5   : > { %v506_v22 = vmax.f32 %v489_v15, 0.0 }
  0xe9   : > { %v461_v16 = vpop.f32.mrf.mxu0 }
  0xea   : > { %v462_v17 = vadd.f32 %v461_v16, %v2216_v23  ;;  %v490_v18 = vpop.f32.mrf.mxu1  ;;  %v1653_v23 = vld [vmem:[%s2392_s5 + $0x48] sm:$0xff] }
  0xeb   : > { %v491_v19 = vadd.f32 %v490_v18, %v2218_v24  ;;  %v1645_v24 = vld [vmem:[%s2392_s5 + $0x8] sm:$0xff]  ;;  %1020 = vmatpush.bf16.msrb.mxu3 %v1653_v23 }
  0xec   : > { %v507_v21 = vmax.f32 %v462_v17, 0.0  ;;  %991 = vmatpush.bf16.msrb.mxu2 %v1645_v24 }
  0xed   : > { %v508_v25 = vmax.f32 %v491_v19, 0.0 }
  0xee   : > { %v515_v26 = vpack.c.bf16 %v507_v21, %v505_v20 }
  0xef   : > { %v516_v27 = vpack.c.bf16 %v508_v25, %v506_v22  ;;  %1021 = vmatpush.bf16.msrb.mxu3 %v1652_v29 }
  0xf0   : > { %738 = vmatmul.bf16.gmra.mxu2 %v515_v26  ;;  %796 = vmatmul.bf16.gmra.mxu0 %v515_v26 }
  0xf1   : > { %767 = vmatmul.bf16.gmra.mxu3 %v516_v27  ;;  %825 = vmatmul.bf16.gmra.mxu1 %v516_v27 }
  0xf2   : > { %992 = vmatpush.bf16.msrb.mxu2 %v1644_v30 }
 0x13d   : > { %v782_v32 = vpop.f32.mrf.mxu0 }
 0x13e   : > { %v811_v34 = vpop.f32.mrf.mxu1  ;;  %v783_v35 = vadd.f32 %v782_v32, %v2287_v33 }
 0x140   : > { %v812_v40 = vadd.f32 %v811_v34, %v783_v35 }
 0x142   : > { %v832_v45 = vmax.f32 %v812_v40, 0.0 }
 0x143   : > { %v724_v36 = vpop.f32.mrf.mxu2 }
 0x144   : > { %v753_v38 = vpop.f32.mrf.mxu3  ;;  %v725_v43 = vadd.f32 %v724_v36, %v2290_v37 }
 0x145   : > { %v784_v39 = vpop.f32.mrf.mxu0 }
 0x146   : > { %v785_v41 = vadd.f32 %v784_v39, %v2287_v33  ;;  %v813_v42 = vpop.f32.mrf.mxu1  ;;  %v754_v48 = vadd.f32 %v753_v38, %v725_v43 }
 0x148   : > { %v814_v44 = vadd.f32 %v813_v42, %v785_v41  ;;  %v831_v55 = vmax.f32 %v754_v48, 0.0 }
 0x14a   : > { %v834_v46 = vmax.f32 %v814_v44, 0.0 }
 0x14b   : > { %v726_v47 = vpop.f32.mrf.mxu2 }
 0x14c   : > { %v848_v49 = vpack.c.bf16 %v834_v46, %v832_v45  ;;  %v727_v50 = vadd.f32 %v726_v47, %v2290_v37  ;;  %v755_v51 = vpop.f32.mrf.mxu3 }
 0x14d   : > { %v787_v52 = vpop.f32.mrf.mxu0 }
 0x14e   : > { %v756_v53 = vadd.f32 %v755_v51, %v727_v50  ;;  %v816_v54 = vpop.f32.mrf.mxu1  ;;  %1022 = vmatmul.bf16.vlgmr.msrb.gmra.mxu3 %v848_v49  ;;  %v788_v58 = vadd.f32 %v787_v52, %v2287_v33 }
 0x150   : > { %v833_v56 = vmax.f32 %v756_v53, 0.0  ;;  %v817_v62 = vadd.f32 %v816_v54, %v788_v58 }
 0x152   : > { %v847_v57 = vpack.c.bf16 %v833_v56, %v831_v55  ;;  %v836_v3 = vmax.f32 %v817_v62, 0.0 }
 0x153   : > { %v729_v59 = vpop.f32.mrf.mxu2 }
 0x154   : > { %v758_v60 = vpop.f32.mrf.mxu3  ;;  %993 = vmatmul.bf16.vlgmr.msrb.gmra.mxu2 %v847_v57  ;;  %v730_v1 = vadd.f32 %v729_v59, %v2290_v37 }
 0x155   : > { %v789_v61 = vpop.f32.mrf.mxu0 }
 0x156   : > { %v790_v63 = vadd.f32 %v789_v61, %v2287_v33  ;;  %v818_v0 = vpop.f32.mrf.mxu1  ;;  %v759_v6 = vadd.f32 %v758_v60, %v730_v1  ;;  %v888_v60 = vstv %s887_s28 }
 0x158   : > { %v819_v2 = vadd.f32 %v818_v0, %v790_v63  ;;  %v835_v13 = vmax.f32 %v759_v6, 0.0 }
 0x15a   : > { %v838_v4 = vmax.f32 %v819_v2, 0.0 }
 0x15b   : > { %v731_v5 = vpop.f32.mrf.mxu2 }
 0x15c   : > { %v732_v7 = vadd.f32 %v731_v5, %v2290_v37  ;;  %v760_v8 = vpop.f32.mrf.mxu3  ;;  %v850_v9 = vpack.c.bf16 %v838_v4, %v836_v3 }
 0x15d   : > { %v792_v10 = vpop.f32.mrf.mxu0 }
 0x15e   : > { %v761_v11 = vadd.f32 %v760_v8, %v732_v7  ;;  %v821_v12 = vpop.f32.mrf.mxu1  ;;  %1027 = vmatmul.bf16.gmra.mxu3 %v850_v9  ;;  %v793_v15 = vadd.f32 %v792_v10, %v2287_v33 }
 0x160   : > { %v837_v14 = vmax.f32 %v761_v11, 0.0  ;;  %v822_v20 = vadd.f32 %v821_v12, %v793_v15 }
 0x162   : > { %v849_v16 = vpack.c.bf16 %v837_v14, %v835_v13  ;;  %v840_v27 = vmax.f32 %v822_v20, 0.0 }
 0x163   : > { %v734_v17 = vpop.f32.mrf.mxu2 }
 0x164   : > { %v763_v18 = vpop.f32.mrf.mxu3  ;;  %998 = vmatmul.bf16.gmra.mxu2 %v849_v16  ;;  %v735_v25 = vadd.f32 %v734_v17, %v2290_v37 }
 0x165   : > { %v794_v19 = vpop.f32.mrf.mxu0 }
 0x166   : > { %v795_v21 = vadd.f32 %v794_v19, %v2287_v33  ;;  %v823_v22 = vpop.f32.mrf.mxu1  ;;  %v764_v24 = vadd.f32 %v763_v18, %v735_v25 }
 0x168   : > { %v824_v26 = vadd.f32 %v823_v22, %v795_v21  ;;  %v839_v36 = vmax.f32 %v764_v24, 0.0 }
 0x16a   : > { %v842_v28 = vmax.f32 %v824_v26, 0.0 }
 0x16b   : > { %v736_v23 = vpop.f32.mrf.mxu2 }
 0x16c   : > { %v737_v29 = vadd.f32 %v736_v23, %v2290_v37  ;;  %v765_v30 = vpop.f32.mrf.mxu3  ;;  %v852_v31 = vpack.c.bf16 %v842_v28, %v840_v27 }
 0x16d   : > { %v797_v32 = vpop.f32.mrf.mxu0 }
 0x16e   : > { %v766_v34 = vadd.f32 %v765_v30, %v737_v29  ;;  %v826_v35 = vpop.f32.mrf.mxu1  ;;  %1032 = vmatmul.bf16.gmra.mxu3 %v852_v31  ;;  %v798_v39 = vadd.f32 %v797_v32, %v2287_v33 }
 0x170   : > { %v841_v38 = vmax.f32 %v766_v34, 0.0  ;;  %v827_v44 = vadd.f32 %v826_v35, %v798_v39 }
 0x172   : > { %v851_v40 = vpack.c.bf16 %v841_v38, %v839_v36  ;;  %v844_v49 = vmax.f32 %v827_v44, 0.0 }
 0x173   : > { %v739_v41 = vpop.f32.mrf.mxu2 }
 0x174   : > { %v768_v42 = vpop.f32.mrf.mxu3  ;;  %1003 = vmatmul.bf16.gmra.mxu2 %v851_v40  ;;  %v740_v47 = vadd.f32 %v739_v41, %v2290_v37 }
 0x175   : > { %v799_v43 = vpop.f32.mrf.mxu0 }
 0x176   : > { %v800_v45 = vadd.f32 %v799_v43, %v2287_v33  ;;  %v828_v46 = vpop.f32.mrf.mxu1  ;;  %v769_v52 = vadd.f32 %v768_v42, %v740_v47 }
 0x178   : > { %v829_v48 = vadd.f32 %v828_v46, %v800_v45  ;;  %v843_v57 = vmax.f32 %v769_v52, 0.0 }
 0x17a   : > { %v846_v50 = vmax.f32 %v829_v48, 0.0 }
 0x17b   : > { %v741_v51 = vpop.f32.mrf.mxu2 }
 0x17c   : > { %v742_v53 = vadd.f32 %v741_v51, %v2290_v37  ;;  %v854_v54 = vpack.c.bf16 %v846_v50, %v844_v49  ;;  %v770_v55 = vpop.f32.mrf.mxu3 }
 0x17e   : > { %v771_v56 = vadd.f32 %v770_v55, %v742_v53  ;;  %1037 = vmatmul.bf16.gmra.mxu3 %v854_v54 }
 0x180   : > { %v845_v58 = vmax.f32 %v771_v56, 0.0 }
 0x182   : > { %v853_v59 = vpack.c.bf16 %v845_v58, %v843_v57 }
 0x184   : > { %1008 = vmatmul.bf16.gmra.mxu2 %v853_v59 }
 0x1d1   : > { %v1023_v33 = vpop.f32.mrf.mxu3 }
 0x1d7   : > { %v994_v61 = vpop.f32.mrf.mxu2 }
 0x1d8   : > { %v995_v62 = vadd.f32 %v994_v61, %v888_v60 }
 0x1d9   : > { %v1025_v63 = vpop.f32.mrf.mxu3 }
 0x1da   : > { %v1024_v0 = vadd.f32 %v1023_v33, %v995_v62 }
 0x1dc   : > { %1044 = vst.msk [vmem:[%s2308_s12] sm:$0xff] %vm1043_vm0, %v1024_v0 }
 0x1df   : > { %v996_v37 = vpop.f32.mrf.mxu2 }
 0x1e0   : > { %v997_v1 = vadd.f32 %v996_v37, %v888_v60 }
 0x1e1   : > { %v1028_v2 = vpop.f32.mrf.mxu3 }
 0x1e2   : > { %v1026_v3 = vadd.f32 %v1025_v63, %v997_v1 }
 0x1e4   : > { %1045 = vst.msk [vmem:[%s2308_s12 + $0x8] sm:$0xff] %vm1043_vm0, %v1026_v3 }
 0x1e7   : > { %v999_v4 = vpop.f32.mrf.mxu2 }
 0x1e8   : > { %v1000_v5 = vadd.f32 %v999_v4, %v888_v60 }
 0x1e9   : > { %v1030_v6 = vpop.f32.mrf.mxu3 }
 0x1ea   : > { %v1029_v7 = vadd.f32 %v1028_v2, %v1000_v5 }
 0x1ec   : > { %1046 = vst.msk [vmem:[%s2308_s12 + $0x10] sm:$0xff] %vm1043_vm0, %v1029_v7 }
 0x1ef   : > { %v1001_v8 = vpop.f32.mrf.mxu2 }
 0x1f0   : > { %v1002_v9 = vadd.f32 %v1001_v8, %v888_v60 }
 0x1f1   : > { %v1033_v11 = vpop.f32.mrf.mxu3 }
 0x1f2   : > { %v1031_v10 = vadd.f32 %v1030_v6, %v1002_v9 }
 0x1f4   : > { %1047 = vst.msk [vmem:[%s2308_s12 + $0x18] sm:$0xff] %vm1043_vm0, %v1031_v10 }
 0x1f7   : > { %v1004_v12 = vpop.f32.mrf.mxu2 }
 0x1f8   : > { %v1005_v13 = vadd.f32 %v1004_v12, %v888_v60 }
 0x1f9   : > { %v1035_v15 = vpop.f32.mrf.mxu3 }
 0x1fa   : > { %v1034_v14 = vadd.f32 %v1033_v11, %v1005_v13 }
 0x1fc   : > { %1048 = vst.msk [vmem:[%s2308_s12 + $0x20] sm:$0xff] %vm1043_vm0, %v1034_v14 }
 0x1ff   : > { %v1006_v16 = vpop.f32.mrf.mxu2 }
 0x200   : > { %v1007_v17 = vadd.f32 %v1006_v16, %v888_v60 }
 0x201   : > { %v1038_v19 = vpop.f32.mrf.mxu3 }
 0x202   : > { %v1036_v18 = vadd.f32 %v1035_v15, %v1007_v17 }
 0x204   : > { %1049 = vst.msk [vmem:[%s2308_s12 + $0x28] sm:$0xff] %vm1043_vm0, %v1036_v18 }
 0x207   : > { %v1009_v20 = vpop.f32.mrf.mxu2 }
 0x208   : > { %v1010_v21 = vadd.f32 %v1009_v20, %v888_v60 }
 0x209   : > { %v1040_v27 = vpop.f32.mrf.mxu3 }
 0x20a   : > { %v1039_v22 = vadd.f32 %v1038_v19, %v1010_v21 }
 0x20c   : > { %1050 = vst.msk [vmem:[%s2308_s12 + $0x30] sm:$0xff] %vm1043_vm0, %v1039_v22 }
 0x20f   : > { %v1011_v25 = vpop.f32.mrf.mxu2 }
 0x210   : > { %v1012_v26 = vadd.f32 %v1011_v25, %v888_v60  ;;  %1058 = sbr.rel (!%p1907_p4) target bundleno = 575 (0x23f), region = 52 }
 0x212   : > { %v1041_v28 = vadd.f32 %v1040_v27, %v1012_v26 }
 0x214   : > { %1051 = vst.msk [vmem:[%s2308_s12 + $0x38] sm:$0xff] %vm1043_vm0, %v1041_v28 }
 0x215   : > { %s2404_s26 = smov (!%p1061_p8, %s1060_s26), 8 }
 0x216   : > { %s1577_s17 = sshll.u32 %s2404_s26, 3 }
 0x217   : > { %p1580_p9 = scmp.eq.s32.totalorder %s1577_s17, 0 }
 0x218   : > { %s2339_s18 = sshrl.u32 (!%p1580_p9), %s2404_s26, 3 }
 0x219   : > { %1069 = sbr.rel (%p1580_p9) target bundleno = 575 (0x23f), region = 56  ;;  %p1581_p10 = scmp.le.s32.totalorder (!%p1580_p9), %s2339_s18, 0 }
 0x21e   : > { %1252 = sbr.rel (%p1581_p10) target bundleno = 558 (0x22e), region = 132  ;;  %s2396_s6 = smov (!%p1581_p10), %s2333_s16 }
 0x21f   : > { %s2397_s10 = smov (!%p1581_p10), %s2308_s12  ;;  %s2348_s15 = smov (!%p1581_p10), 0  }
 0x220   : > { %s2350_s19 = smov (!%p1581_p10), 0  }
 0x223 LB: >> { %v1146_v23 = vld [vmem:[%s1813_s10] sm:$0xff]  ;;  %v1148_v24 = vld [vmem:[%s1813_s10 + $0x8] sm:$0xff]  ;;  %v1150_v29 = vld [vmem:[%s1813_s10 + $0x10] sm:$0xff]  ;;  %s1162_s20 = sadd.s32 1, %s1817_s15  ;;  %s1140_s19 = sadd.s32 1, %s1821_s19   ;;  %s1821_s19 = sphi %s2350_s19, %s1140_s19   ;;  %s1817_s15 = sphi %s2348_s15, %s2399_s15   ;;  %s1813_s10 = sphi %s2397_s10, %s1167_s10   ;;  %s1809_s6 = sphi %s2396_s6, %s2398_s6  }
 0x224   : >> { %1147 = vst [vmem:[%s1809_s6] sm:$0xff] %v1146_v23  ;;  %v1152_v30 = vld [vmem:[%s1813_s10 + $0x18] sm:$0xff]  ;;  %p1163_p11 = scmp.ge.s32.totalorder %s1162_s20, %s2339_s18  ;;  %v1154_v31 = vld [vmem:[%s1813_s10 + $0x20] sm:$0xff]  ;;  %v1156_v32 = vld [vmem:[%s1813_s10 + $0x28] sm:$0xff]  ;;  %p1139_p12 = scmp.ge.s32.totalorder %s1140_s19, %s2339_s18 }
 0x225   : >> { %1149 = vst [vmem:[%s1809_s6 + $0x8] sm:$0xff] %v1148_v24  ;;  %v1158_v34 = vld [vmem:[%s1813_s10 + $0x30] sm:$0xff]  ;;  %v1160_v35 = vld [vmem:[%s1813_s10 + $0x38] sm:$0xff] }
 0x226   : >> { %1151 = vst [vmem:[%s1809_s6 + $0x10] sm:$0xff] %v1150_v29  ;;  %s2406_s20 = smov (%p1163_p11, %s1162_s20), 0 }
 0x227   : >> { %1153 = vst [vmem:[%s1809_s6 + $0x18] sm:$0xff] %v1152_v30  ;;  %s1582_s21 = sshll.u32 %s2406_s20, 6  ;;  %s2399_s15 = smov %s2406_s20 }
 0x228   : >> { %1155 = vst [vmem:[%s1809_s6 + $0x20] sm:$0xff] %v1154_v31  ;;  %s1167_s10 = scalar_lea.vmem %s2308_s12, %s1582_s21 [#allocation3]   ;;  %s1168_s22 = scalar_lea.vmem %s2333_s16, %s1582_s21  }
 0x229   : >> { %1157 = vst [vmem:[%s1809_s6 + $0x28] sm:$0xff] %v1156_v32  ;;  %1142 = sbr.rel (!%p1139_p12) target bundleno = 547 (0x223), region = 138 }
 0x22a   : >> { %1159 = vst [vmem:[%s1809_s6 + $0x30] sm:$0xff] %v1158_v34 }
 0x22b   : >> { %1161 = vst [vmem:[%s1809_s6 + $0x38] sm:$0xff] %v1160_v35  ;;  %s2398_s6 = smov %s1168_s22 }
 0x22e PF: > { %s2369_s23 = sand.u32 7, %s2404_s26   ;;  %s1661_s24 = sshll.u32 %s2339_s18, 6 }
 0x22f   : > { %s1173_s25 = scalar_lea.vmem %s2308_s12, %s1661_s24 [#allocation3]   ;;  %s1175_s28 = scalar_lea.vmem %s2333_s16, %s1661_s24  }
 0x230   : > { %p1587_p13 = scmp.le.s32.totalorder %s2369_s23, 0 }
 0x231   : > { %s1823_s8 = smov (!%p1587_p13), %s1175_s28   ;;  %s1827_s11 = smov (!%p1587_p13), %s1173_s25  }
 0x232   : > { %1266 = sbr.rel (%p1587_p13) target bundleno = 575 (0x23f), region = 143  ;;  %s1831_s13 = smov (!%p1587_p13), 0  }
 0x233   : > { %s1835_s30 = smov (!%p1587_p13), 0  }
 0x237 LB: >> { %v1185_v36 = vld [vmem:[%s1829_s11] sm:$0xff]  ;;  %s1187_s26 = sadd.s32 1, %s1833_s13  ;;  %s1179_s30 = sadd.s32 1, %s1837_s30   ;;  %s1837_s30 = sphi %s1835_s30, %s1179_s30   ;;  %s1833_s13 = sphi %s1831_s13, %s1832_s13   ;;  %s1829_s11 = sphi %s1827_s11, %s1192_s11   ;;  %s1825_s8 = sphi %s1823_s8, %s1193_s8  }
 0x238   : >> { %1186 = vst [vmem:[%s1825_s8] sm:$0xff] %v1185_v36  ;;  %p1188_p0 = scmp.ge.s32.totalorder %s1187_s26, %s2369_s23  ;;  %p1178_p1 = scmp.ge.s32.totalorder %s1179_s30, %s2369_s23 }
 0x23a   : >> { %s2408_s26 = smov (%p1188_p0, %s1187_s26), 0  ;;  %1181 = sbr.rel (!%p1178_p1) target bundleno = 567 (0x237), region = 149 }
 0x23b   : >> { %s1588_s12 = sshll.u32 %s2408_s26, 3  ;;  %s1832_s13 = smov %s2408_s26  }
 0x23c   : >> { %s1192_s11 = scalar_lea.vmem %s1173_s25, %s1588_s12 [#allocation3]   ;;  %s1193_s8 = scalar_lea.vmem %s1175_s28, %s1588_s12  }
 0x23f PF: > { %p15_p2 = scmp.ge.s32.totalorder %s1897_s29, 5   ;;  %s2400_s26 = smov %s1801_s27 }
 0x240   : > { %s2401_s27 = smov %s1905_s9  ;;  %s2402_s28 = smov %s1897_s29 }
 0x241   :  { %17 = sbr.rel (!%p15_p2) target bundleno = 4 (0x4), region = 160 }

</bundles_post_ra>
